<compile_context>
chip_gen: v6e
topology: v6e:2x2x1
jax: 0.10.0
libtpu: 0.0.40
codegen_flags: <defaults>
</compile_context>

<pallas_src>
import functools

import jax
import jax.numpy as jnp
from jax.experimental import pallas as pl
from jax.experimental.pallas import tpu as pltpu

LANE = 128
SUBLANE = 8
DEFAULT_B_TILE = 2048     # out block = B_TILE*128*4 B = 1 MiB; double-buffered fits all gens
NEG_INF_BIAS = -1e30


def _round_up(x, m):
    return (x + m - 1) // m * m


def _policy_kernel(x_ref, w1_ref, b1_ref, w2_ref, b2_ref, o_ref):
    # fc1: MXU (bf16 operands, f32 accumulation), then bias + ReLU in f32.
    z1 = jnp.dot(x_ref[...], w1_ref[...], preferred_element_type=jnp.float32)
    z1 = jnp.maximum(z1 + b1_ref[...], 0.0)
    # fc2: feed the MXU in the weights' storage dtype, accumulate f32.
    w2 = w2_ref[...]
    z2 = jnp.dot(z1.astype(w2.dtype), w2, preferred_element_type=jnp.float32)
    z2 = z2 + b2_ref[...]  # padded action columns carry a -1e30 bias -> ~0 probability
    # numerically-stable softmax over the (lane-dense, padded) action axis
    z2 = z2 - jnp.max(z2, axis=-1, keepdims=True)
    e = jnp.exp(z2)
    inv = pl.reciprocal(jnp.sum(e, axis=-1, keepdims=True), approx=True)
    o_ref[...] = (e * inv).astype(o_ref.dtype)


@functools.partial(jax.jit, static_argnames=("action_dim", "b_tile"))
def policy_net_forward(state, w1, b1, w2_p, b2_p, *, action_dim, b_tile=DEFAULT_B_TILE):
    """Full PolicyNet forward in one pallas_call, tiled over the batch.

    w1/w2_p are stored (in_features, out_features) in the MXU compute dtype (bf16 by
    default); w2_p/b2_p are lane-padded to a multiple of 128 actions with -1e30 bias in
    the pad columns. Biases stay f32 (f32 epilogue)."""
    batch, state_dim = state.shape
    act_pad = w2_p.shape[1]

    # Cast matmul input to the weights' storage dtype (halves state DMA bytes for bf16).
    state = state.astype(w1.dtype)

    bt = min(b_tile, _round_up(batch, SUBLANE))
    batch_pad = _round_up(batch, bt)
    if batch_pad != batch:
        state = jnp.pad(state, ((0, batch_pad - batch), (0, 0)))

    probs = pl.pallas_call(
        _policy_kernel,
        out_shape=jax.ShapeDtypeStruct((batch_pad, act_pad), jnp.float32),
        grid=(batch_pad // bt,),
        in_specs=[
            pl.BlockSpec((bt, state_dim), lambda i: (i, 0)),
            pl.BlockSpec(w1.shape, lambda i: (0, 0)),    # weights: constant index_map,
            pl.BlockSpec(b1.shape, lambda i: (0, 0)),    # stay VMEM-resident across grid
            pl.BlockSpec(w2_p.shape, lambda i: (0, 0)),
            pl.BlockSpec(b2_p.shape, lambda i: (0, 0)),
        ],
        out_specs=pl.BlockSpec((bt, act_pad), lambda i: (i, 0)),
        compiler_params=pltpu.CompilerParams(
            dimension_semantics=("parallel",),           # v7x: batch axis over both TCs
        ),
    )(state, w1, b1, w2_p, b2_p)
    return probs[:batch, :action_dim]


def init_policy_params(key, state_dim, hidden_dim, action_dim, compute_dtype=jnp.bfloat16):
    """nn.Linear-style U(-1/sqrt(fan_in), 1/sqrt(fan_in)) init, weights stored (in, out).

    Returns (kernel_params, raw_f32_params):
      kernel_params = (w1[bf16], b1[f32], w2_padded[bf16, out padded to 128 lanes],
                       b2_padded[f32, pads = -1e30])
    """
    k1, k2, k3, k4 = jax.random.split(key, 4)
    bound1 = 1.0 / jnp.sqrt(jnp.float32(state_dim))
    bound2 = 1.0 / jnp.sqrt(jnp.float32(hidden_dim))
    w1 = jax.random.uniform(k1, (state_dim, hidden_dim), jnp.float32, -bound1, bound1)
    b1 = jax.random.uniform(k2, (1, hidden_dim), jnp.float32, -bound1, bound1)
    w2 = jax.random.uniform(k3, (hidden_dim, action_dim), jnp.float32, -bound2, bound2)
    b2 = jax.random.uniform(k4, (1, action_dim), jnp.float32, -bound2, bound2)

    act_pad = _round_up(max(action_dim, LANE), LANE)
    w2_p = jnp.zeros((hidden_dim, act_pad), jnp.float32).at[:, :action_dim].set(w2)
    b2_p = jnp.full((1, act_pad), NEG_INF_BIAS, jnp.float32).at[:, :action_dim].set(b2)

    kernel_params = (w1.astype(compute_dtype), b1, w2_p.astype(compute_dtype), b2_p)
    raw_params = (w1, b1, w2, b2)
    return kernel_params, raw_params


def _reference_forward(state, w1, b1, w2, b2, compute_dtype=jnp.bfloat16):
    """Pure-JAX reference following the same bf16-matmul / f32-epilogue dtype path."""
    cd = compute_dtype
    z1 = jnp.dot(state.astype(cd), w1.astype(cd), preferred_element_type=jnp.float32) + b1
    z1 = jnp.maximum(z1, 0.0)
    z2 = jnp.dot(z1.astype(cd), w2.astype(cd), preferred_element_type=jnp.float32) + b2
    return jax.nn.softmax(z2, axis=-1)


if __name__ == "__main__":
    state_dim, hidden_dim, action_dim = 4, 32, 8
    batch = 2

    key = jax.random.PRNGKey(0)
    k_params, k_state = jax.random.split(key)
    (w1, b1, w2_p, b2_p), (rw1, rb1, rw2, rb2) = init_policy_params(
        k_params, state_dim, hidden_dim, action_dim
    )
    state = jax.random.normal(k_state, (batch, state_dim), jnp.float32)

    out = policy_net_forward(state, w1, b1, w2_p, b2_p, action_dim=action_dim)
    out = jax.block_until_ready(out)

    ref = _reference_forward(state, rw1, rb1, rw2, rb2)
    assert out.shape == (batch, action_dim)
    # approx reciprocal -> per-row sums within ~1e-3 of 1.0
    assert jnp.allclose(jnp.sum(out, axis=-1), 1.0, atol=5e-3)
    assert jnp.allclose(out, ref, atol=5e-3, rtol=5e-3)

    print("KERNEL_OK")
</pallas_src>

<mosaic_0001>
module attributes {stable_mosaic.version = 11 : i64} {
  func.func @_policy_kernel(%arg0: i32, %arg1: memref<8x4xbf16, #tpu.memory_space<vmem>>, %arg2: memref<4x32xbf16, #tpu.memory_space<vmem>>, %arg3: memref<1x32xf32, #tpu.memory_space<vmem>>, %arg4: memref<32x128xbf16, #tpu.memory_space<vmem>>, %arg5: memref<1x128xf32, #tpu.memory_space<vmem>>, %arg6: memref<8x128xf32, #tpu.memory_space<vmem>>) attributes {dimension_semantics = [#tpu.dimension_semantics<parallel>], iteration_bounds = array<i64: 1>, scalar_prefetch = 0 : i64, scratch_operands = 0 : i64, tpu.core_type = #tpu.core_type<tc>, window_params = [{transform_indices = @transform_0, window_bounds = array<i64: 8, 4>}, {pipeline_mode = #tpu.pipeline_mode<synchronous>, transform_indices = @transform_1, window_bounds = array<i64: 4, 32>}, {pipeline_mode = #tpu.pipeline_mode<synchronous>, transform_indices = @transform_2, window_bounds = array<i64: 1, 32>}, {pipeline_mode = #tpu.pipeline_mode<synchronous>, transform_indices = @transform_3, window_bounds = array<i64: 32, 128>}, {pipeline_mode = #tpu.pipeline_mode<synchronous>, transform_indices = @transform_4, window_bounds = array<i64: 1, 128>}, {transform_indices = @transform_5, window_bounds = array<i64: 8, 128>}]} {
    %c0 = arith.constant 0 : index
    %c0_0 = arith.constant 0 : index
    %0 = vector.load %arg1[%c0, %c0_0] : memref<8x4xbf16, #tpu.memory_space<vmem>>, vector<8x4xbf16>
    %c0_1 = arith.constant 0 : index
    %c0_2 = arith.constant 0 : index
    %1 = vector.load %arg2[%c0_1, %c0_2] : memref<4x32xbf16, #tpu.memory_space<vmem>>, vector<4x32xbf16>
    %cst = arith.constant dense<0.000000e+00> : vector<8x32xf32>
    %2 = tpu.matmul %0, %1, %cst {dimension_numbers = #tpu.dot_dimension_numbers<[1], [0], [0], [1], [0, 0, 1, 1], [], []>} : vector<8x4xbf16>, vector<4x32xbf16>, vector<8x32xf32> -> vector<8x32xf32>
    %c0_3 = arith.constant 0 : index
    %c0_4 = arith.constant 0 : index
    %3 = vector.load %arg3[%c0_3, %c0_4] : memref<1x32xf32, #tpu.memory_space<vmem>>, vector<1x32xf32>
    %4 = vector.broadcast %3 : vector<1x32xf32> to vector<8x32xf32>
    %5 = arith.addf %2, %4 : vector<8x32xf32>
    %cst_5 = arith.constant 0.000000e+00 : f32
    %6 = vector.broadcast %cst_5 : f32 to vector<8x32xf32>
    %7 = arith.maximumf %5, %6 : vector<8x32xf32>
    %c0_6 = arith.constant 0 : index
    %c0_7 = arith.constant 0 : index
    %8 = vector.load %arg4[%c0_6, %c0_7] : memref<32x128xbf16, #tpu.memory_space<vmem>>, vector<32x128xbf16>
    %9 = arith.truncf %7 : vector<8x32xf32> to vector<8x32xbf16>
    %cst_8 = arith.constant dense<0.000000e+00> : vector<8x128xf32>
    %10 = tpu.matmul %9, %8, %cst_8 {dimension_numbers = #tpu.dot_dimension_numbers<[1], [0], [0], [1], [0, 0, 1, 1], [], []>} : vector<8x32xbf16>, vector<32x128xbf16>, vector<8x128xf32> -> vector<8x128xf32>
    %c0_9 = arith.constant 0 : index
    %c0_10 = arith.constant 0 : index
    %11 = vector.load %arg5[%c0_9, %c0_10] : memref<1x128xf32, #tpu.memory_space<vmem>>, vector<1x128xf32>
    %12 = vector.broadcast %11 : vector<1x128xf32> to vector<8x128xf32>
    %13 = arith.addf %10, %12 : vector<8x128xf32>
    %cst_11 = arith.constant dense<0xFF800000> : vector<8xf32>
    %14 = vector.multi_reduction <maximumf>, %13, %cst_11 [1] : vector<8x128xf32> to vector<8xf32>
    %15 = vector.shape_cast %14 : vector<8xf32> to vector<8x1xf32>
    %16 = vector.broadcast %15 : vector<8x1xf32> to vector<8x128xf32>
    %17 = arith.subf %13, %16 : vector<8x128xf32>
    %18 = math.exp %17 : vector<8x128xf32>
    %cst_12 = arith.constant dense<0.000000e+00> : vector<8xf32>
    %19 = vector.multi_reduction <add>, %18, %cst_12 [1] : vector<8x128xf32> to vector<8xf32>
    %20 = vector.shape_cast %19 : vector<8xf32> to vector<8x1xf32>
    %21 = tpu.reciprocal %20 {approx = true} : vector<8x1xf32> -> vector<8x1xf32>
    %22 = vector.broadcast %21 : vector<8x1xf32> to vector<8x128xf32>
    %23 = arith.mulf %18, %22 : vector<8x128xf32>
    %c0_13 = arith.constant 0 : index
    %c0_14 = arith.constant 0 : index
    %24 = vector.load %arg6[%c0_13, %c0_14] : memref<8x128xf32, #tpu.memory_space<vmem>>, vector<8x128xf32>
    tpu.vector_store %arg6[%c0_13, %c0_14], %23 {strides = array<i32>} : memref<8x128xf32, #tpu.memory_space<vmem>>, vector<8x128xf32>,
    return
  }
  func.func @transform_0(%arg0: i32) -> (i32, i32) {
    %c0_i32 = arith.constant 0 : i32
    %c0_i32_0 = arith.constant 0 : i32
    return %arg0, %c0_i32 : i32, i32
  }
  func.func @transform_1(%arg0: i32) -> (i32, i32) {
    %c0_i32 = arith.constant 0 : i32
    %c0_i32_0 = arith.constant 0 : i32
    %c0_i32_1 = arith.constant 0 : i32
    return %c0_i32, %c0_i32_0 : i32, i32
  }
  func.func @transform_2(%arg0: i32) -> (i32, i32) {
    %c0_i32 = arith.constant 0 : i32
    %c0_i32_0 = arith.constant 0 : i32
    %c0_i32_1 = arith.constant 0 : i32
    return %c0_i32, %c0_i32_0 : i32, i32
  }
  func.func @transform_3(%arg0: i32) -> (i32, i32) {
    %c0_i32 = arith.constant 0 : i32
    %c0_i32_0 = arith.constant 0 : i32
    %c0_i32_1 = arith.constant 0 : i32
    return %c0_i32, %c0_i32_0 : i32, i32
  }
  func.func @transform_4(%arg0: i32) -> (i32, i32) {
    %c0_i32 = arith.constant 0 : i32
    %c0_i32_0 = arith.constant 0 : i32
    %c0_i32_1 = arith.constant 0 : i32
    return %c0_i32, %c0_i32_0 : i32, i32
  }
  func.func @transform_5(%arg0: i32) -> (i32, i32) {
    %c0_i32 = arith.constant 0 : i32
    %c0_i32_0 = arith.constant 0 : i32
    return %arg0, %c0_i32 : i32, i32
  }
}

</mosaic_0001>

<bundles_post_ra>
// kernel: policy_net_forward.1
= control target key start
LH: loop header
LB: loop body
LE: loop exit
PB: predicated region body
PF: predicated region fallthrough
CT: control target
= control target key end

     0   :  { %10 = vsyncpa [#allocation3], 0  ;;  %s234_s18 = smov [#allocation2]   ;;  %s287_s0 = inlined_call_operand.vmem [shape: bf16[8,4], index: 0, kind: input, shape index: {}]   ;;  %s288_s1 = inlined_call_operand.vmem [shape: bf16[4,32], index: 1, kind: input, shape index: {}]   ;;  %s289_s2 = inlined_call_operand.vmem [shape: f32[1,32], index: 2, kind: input, shape index: {}]   ;;  %s290_s3 = inlined_call_operand.hbm [shape: bf16[32,128], index: 3, kind: input, shape index: {}]   ;;  %s291_s4 = inlined_call_operand.vmem [shape: f32[1,128], index: 4, kind: input, shape index: {}]   ;;  %s292_s5 = inlined_call_operand.vmem [shape: f32[8,128], index: 5, kind: output, shape index: {}]  }
   0x1   :  { %s22_s19 = sshll.u32 %s234_s18, 4  ;;  %s23_s19 = int_to_ptr.vmem [resolvable:$true] %s22_s19 }
   0x2   :  { %s220_s20 = scalar_lea.vmem %s23_s19, 256  ;;  %p225_p1 = scmp.lt.s32.totalorder %s23_s19, %s23_s19 }
   0x3   :  { %p221_p0 = scmp.ne.s32.totalorder %s23_s19, %s220_s20  ;;  %p226_p2 = scmp.lt.s32.totalorder %s220_s20, %s220_s20 }
   0x5   :  { %p227_p3 = por %p226_p2, %p225_p1 }
   0x7   :  { %p228_p4 = pnand %p227_p3, %p221_p0 }
   0x9   :  { %231 = shalt.err (!%p228_p4)
}
   0xa   :  { %s235_s21 = smov 64   ;;  %s236_s22 = smov 4  }
   0xb   :  { %28 = dma.hbm_to_vmem [thread:$0]  %s290_s3, 256, %s23_s19, [#allocation3], %s235_s21, %s235_s21, %s236_s22  }
   0xc   :  { %232 = dma.done.wait [#allocation3], 256  }
   0xd   :  { %233 = vsyncadd [#allocation3], 4294967040  ;;  %v237_v0 = vmov 0.0   ;;  %vm238_vm0 = vmmov 0   ;;  %vm48_vm1 = vcmask 1041408   ;;  %vm44_vm2 = vcmask 31744  }
   0xe   :  { %187 = vmatprep.subr.bf16.mxu0 %v237_v0  ;;  %189 = vmatprep.mubr.msk.bf16.mxu0 %vm238_vm0, %v237_v0  ;;  %v36_v1 = vld [vmem:[%s288_s1] sm:$0x3]  ;;  %v206_v4 = vld [vmem:[#allocation2 + $0x8] sm:$0xff]   ;;  %vm117_vm3 = vcmask 261120  }
   0xf   :  { %193 = vmatprep.subr.bf16.mxu1 %v237_v0  ;;  %197 = vmatprep.mubr.msk.bf16.mxu1 %vm238_vm0, %v237_v0  ;;  %v50_v2 = vsel %vm48_vm1, %v36_v1, 0  ;;  %v35_v3 = vld [vmem:[%s287_s0] sm:$0xf] }
  0x10   :  { %188 = vmatpush3.bf16.msra.mxu0 %v50_v2  ;;  %194 = vmatpush3.bf16.msra.mxu1 %v206_v4  ;;  %v207_v5 = vld [vmem:[#allocation2] sm:$0xff]  }
  0x11   :  { %195 = vmatprep.subr.bf16.mxu1 %v237_v0  ;;  %v176_v6 = vld [vmem:[%s289_s2] ss:$0 sm:$0xff] }
  0x12   :  { %v178_v14 = vld [vmem:[%s291_s4] ss:$0 sm:$0xff] }
  0x13   :  { %190 = vmatmul.mubr.msk.bf16.vlgmr.msra.gmra.mxu0 %vm44_vm2, %v35_v3 }
  0x14   :  { %196 = vmatpush3.bf16.msra.mxu1 %v207_v5 }
  0xd3   :  { %v86_v7 = vpop.f32.mrf.mxu0 }
  0xd4   :  { %v87_v8 = vadd.f32 %v176_v6, %v86_v7 }
  0xd5   :  { %v191_v9 = vpop.f32.mrf.mxu0 }
  0xd6   :  { %v92_v10 = vmax.f32 %v87_v8, 0.0 }
  0xd7   :  { %v89_v11 = vpop.f32.mrf.mxu0 }
  0xd8   :  { %v97_v12 = vpack.c.bf16 %v92_v10, %v92_v10 }
  0xd9   :  { %v192_v13 = vpop.f32.mrf.mxu0 }
  0xda   :  { %198 = vmatmul.mubr.msk.bf16.vlgmr.msra.gmra.mxu1 %vm117_vm3, %v97_v12 }
 0x19a   :  { %v155_v15 = vpop.f32.mrf.mxu1 }
 0x19b   :  { %v156_v16 = vadd.f32 %v178_v14, %v155_v15 }
 0x19c   :  { %v199_v17 = vpop.f32.mrf.mxu1 }
 0x19d   :  { %161 = vmax.xlane.f32.xlu0 %v156_v16 }
 0x19e   :  { %v158_v18 = vpop.f32.mrf.mxu1 }
 0x1a0   :  { %v200_v19 = vpop.f32.mrf.mxu1 }
 0x226   :  { %v162_v20 = vpop.xlane.xlu0 %161 }
 0x227   :  { %v163_v21 = vsub.f32 %v156_v16, %v162_v20 }
 0x229   :  { %v164_v22 = vmul.f32 1.442695, %v163_v21 }
 0x22b   :  { %208 = vpow2.f32 %v164_v22 }
 0x238   :  { %v209_v23 = vpop.eup %208 }
 0x239   :  { %166 = vadd.xlane.f32.xlu0 %v209_v23 }
 0x2c2   :  { %v167_v24 = vpop.xlane.xlu0 %166 }
 0x2c3   :  { %210 = vrcp.f32 %v167_v24 }
 0x2d0   :  { %v211_v25 = vpop.eup %210 }
 0x2d1   :  { %v169_v26 = vmul.f32 %v211_v25, %v209_v23 }
 0x2d3   :  { %170 = vst [vmem:[%s292_s5] sm:$0xff] %v169_v26 }
 0x2d4   :  { %175 = vsyncpa [#allocation3], 1 }

</bundles_post_ra>
